<compile_context>
chip_gen: v7x
topology: tpu7x:2x2x1
jax: 0.10.0
libtpu: 0.0.40
codegen_flags: <defaults>
</compile_context>

<pallas_src>
import jax
import jax.numpy as jnp
from jax import lax
from jax.experimental import pallas as pl
from jax.experimental.pallas import tpu as pltpu

IN_FEATURES = 768
OUT_FEATURES = 1
DEFAULT_TILE_B = 1024  # 1024x768 f32 = 3 MiB/tile, 6 MiB double-buffered: fits all gens.


def _linear_kernel(x_ref, w_ref, b_ref, o_ref):
    # x_ref: (TILE_B, 768) VMEM   w_ref: (1, 768) VMEM
    # b_ref: (1, 1) SMEM          o_ref: (1, TILE_B) VMEM (lane-dense)
    x = x_ref[...]
    w = w_ref[...]
    # (1, 768) . (TILE_B, 768) contracting the 768 axes -> (1, TILE_B).
    # No transpose needed: both operands keep their natural lane layout.
    y = lax.dot_general(
        w, x,
        dimension_numbers=(((1,), (1,)), ((), ())),
        preferred_element_type=jnp.float32,
    )
    o_ref[...] = (y + b_ref[0, 0]).astype(o_ref.dtype)


def linear_forward(x, weight, bias, tile_b=DEFAULT_TILE_B):
    """Equivalent of BugPartUsedModel.forward(x) == nn.Linear(768, 1)(x).

    x:      (batch, 768) float32
    weight: (1, 768)     float32   (PyTorch [out_features, in_features])
    bias:   (1,)         float32
    returns (batch, 1)   float32
    """
    batch = x.shape[0]

    # Pad batch so the lane-dense output tile is a multiple of 128 and the grid
    # divides evenly; padded rows are zeros and are sliced off afterwards.
    padded = max(pl.cdiv(batch, 128) * 128, 128)
    tile_b = min(tile_b, padded)
    padded = pl.cdiv(padded, tile_b) * tile_b
    pad = padded - batch
    x_p = jnp.pad(x, ((0, pad), (0, 0))) if pad else x

    b2d = bias.reshape(1, 1)
    grid = (padded // tile_b,)

    out = pl.pallas_call(
        _linear_kernel,
        out_shape=jax.ShapeDtypeStruct((1, padded), jnp.float32),
        grid=grid,
        in_specs=[
            # x: one batch tile per grid step (double-buffered by Pallas).
            pl.BlockSpec((tile_b, IN_FEATURES), lambda i: (i, 0)),
            # weight: constant block, stays resident across the grid.
            pl.BlockSpec((OUT_FEATURES, IN_FEATURES), lambda i: (0, 0)),
            # bias: scalar in SMEM.
            pl.BlockSpec(memory_space=pltpu.MemorySpace.SMEM),
        ],
        # Lane-dense output: last dim is the (128-multiple) batch tile.
        out_specs=pl.BlockSpec((1, tile_b), lambda i: (0, i)),
        compiler_params=pltpu.CompilerParams(
            dimension_semantics=("parallel",),
        ),
        cost_estimate=pl.CostEstimate(
            flops=2 * padded * IN_FEATURES,
            transcendentals=0,
            bytes_accessed=(padded * IN_FEATURES * 4      # x
                            + IN_FEATURES * 4             # weight
                            + 4                           # bias
                            + padded * 4),                # output
        ),
    )(x_p, weight, b2d)

    return out[0, :batch].reshape(batch, OUT_FEATURES)


if __name__ == "__main__":
    key = jax.random.PRNGKey(0)
    k_x, k_w, k_b = jax.random.split(key, 3)

    batch = 8
    # Deterministic parameter init (mimicking nn.Linear's uniform init range).
    bound = 1.0 / (IN_FEATURES ** 0.5)
    weight = jax.random.uniform(
        k_w, (OUT_FEATURES, IN_FEATURES), jnp.float32, minval=-bound, maxval=bound
    )
    bias = jax.random.uniform(
        k_b, (OUT_FEATURES,), jnp.float32, minval=-bound, maxval=bound
    )

    x = jax.random.normal(k_x, (batch, IN_FEATURES), jnp.float32)

    out = linear_forward(x, weight, bias)
    out = jax.block_until_ready(out)

    # Cross-check against plain JAX reference.
    ref = x @ weight.T + bias
    assert out.shape == (batch, OUT_FEATURES)
    assert jnp.allclose(out, ref, atol=1e-5, rtol=1e-5)

    print("KERNEL_OK")
</pallas_src>

<mosaic_0001>
module attributes {stable_mosaic.version = 11 : i64} {
  func.func @_linear_kernel(%arg0: i32, %arg1: memref<128x768xf32, #tpu.memory_space<vmem>>, %arg2: memref<1x768xf32, #tpu.memory_space<vmem>>, %arg3: memref<1x1xf32, #tpu.memory_space<smem>>, %arg4: memref<1x128xf32, #tpu.memory_space<vmem>>) attributes {dimension_semantics = [#tpu.dimension_semantics<parallel>], iteration_bounds = array<i64: 1>, scalar_prefetch = 0 : i64, scratch_operands = 0 : i64, tpu.core_type = #tpu.core_type<tc>, window_params = [{transform_indices = @transform_0, window_bounds = array<i64: 128, 768>}, {pipeline_mode = #tpu.pipeline_mode<synchronous>, transform_indices = @transform_1, window_bounds = array<i64: 1, 768>}, {transform_indices = @transform_2, window_bounds = array<i64: 1, 1>}, {transform_indices = @transform_3, window_bounds = array<i64: 1, 128>}]} {
    %c0 = arith.constant 0 : index
    %c0_0 = arith.constant 0 : index
    %0 = vector.load %arg1[%c0, %c0_0] : memref<128x768xf32, #tpu.memory_space<vmem>>, vector<128x768xf32>
    %c0_1 = arith.constant 0 : index
    %c0_2 = arith.constant 0 : index
    %1 = vector.load %arg2[%c0_1, %c0_2] : memref<1x768xf32, #tpu.memory_space<vmem>>, vector<1x768xf32>
    %cst = arith.constant dense<0.000000e+00> : vector<1x128xf32>
    %2 = tpu.matmul %1, %0, %cst {dimension_numbers = #tpu.dot_dimension_numbers<[1], [1], [0], [0], [0, 0, 1, 0], [], []>} : vector<1x768xf32>, vector<128x768xf32>, vector<1x128xf32> -> vector<1x128xf32>
    %c0_3 = arith.constant 0 : index
    %c0_4 = arith.constant 0 : index
    %3 = memref.load %arg3[%c0_3, %c0_4] : memref<1x1xf32, #tpu.memory_space<smem>>
    %4 = vector.broadcast %3 : f32 to vector<1x128xf32>
    %5 = arith.addf %2, %4 : vector<1x128xf32>
    %c0_5 = arith.constant 0 : index
    %c0_6 = arith.constant 0 : index
    %6 = vector.load %arg4[%c0_5, %c0_6] : memref<1x128xf32, #tpu.memory_space<vmem>>, vector<1x128xf32>
    tpu.vector_store %arg4[%c0_5, %c0_6], %5 {strides = array<i32>} : memref<1x128xf32, #tpu.memory_space<vmem>>, vector<1x128xf32>,
    return
  }
  func.func @transform_0(%arg0: i32) -> (i32, i32) {
    %c0_i32 = arith.constant 0 : i32
    %c0_i32_0 = arith.constant 0 : i32
    return %arg0, %c0_i32 : i32, i32
  }
  func.func @transform_1(%arg0: i32) -> (i32, i32) {
    %c0_i32 = arith.constant 0 : i32
    %c0_i32_0 = arith.constant 0 : i32
    %c0_i32_1 = arith.constant 0 : i32
    return %c0_i32, %c0_i32_0 : i32, i32
  }
  func.func @transform_2(%arg0: i32) -> (i32, i32) {
    %c0_i32 = arith.constant 0 : i32
    %c0_i32_0 = arith.constant 0 : i32
    %c0_i32_1 = arith.constant 0 : i32
    return %c0_i32, %c0_i32_0 : i32, i32
  }
  func.func @transform_3(%arg0: i32) -> (i32, i32) {
    %c0_i32 = arith.constant 0 : i32
    %c0_i32_0 = arith.constant 0 : i32
    return %c0_i32, %arg0 : i32, i32
  }
}

</mosaic_0001>

<bundles_post_ra>
// kernel: tpu_custom_call.1
= control target key start
LH: loop header
LB: loop body
LE: loop exit
PB: predicated region body
PF: predicated region fallthrough
CT: control target
= control target key end

     0   :  { %9 = vsyncpa [#allocation4], 0  ;;  %s611_s0 = inlined_call_operand.hbm [shape: f32[128,768], index: 0, kind: input, shape index: {}]   ;;  %s612_s1 = inlined_call_operand.vmem [shape: f32[1,768], index: 1, kind: input, shape index: {}]   ;;  %s613_s2 = inlined_call_operand.<no memory space> [shape: f32[1,1], index: 2, kind: input, shape index: {}]   ;;  %s614_s3 = inlined_call_operand.hbm [shape: f32[1,128], index: 3, kind: output, shape index: {}]  }
   0x1   :  { %10 = vsyncpa [#allocation5], 0  ;;  %s538_s12 = smov [#allocation3]   ;;  %s490_s16 = scalar_lea.hbm %s611_s0, 12288 }
   0x2   :  { %s16_s13 = sshll.u32 %s538_s12, 4  ;;  %p491_p0 = scmp.ne.s32.totalorder %s611_s0, %s490_s16  ;;  %s17_s13 = int_to_ptr.vmem [resolvable:$true] %s16_s13 }
   0x3   :  { %p494_p1 = scmp.lt.u32.totalorder %s490_s16, %s611_s0 }
   0x5   :  { %p496_p2 = pnand %p494_p1, %p491_p0 }
   0x7   :  { %499 = shalt.err (!%p496_p2)
}
   0x8   :  { %s500_s21 = scalar_lea.vmem %s17_s13, 12288  ;;  %p505_p4 = scmp.lt.s32.totalorder %s17_s13, %s17_s13 }
   0x9   :  { %p501_p3 = scmp.ne.s32.totalorder %s17_s13, %s500_s21  ;;  %p506_p5 = scmp.lt.s32.totalorder %s500_s21, %s500_s21 }
   0xb   :  { %p507_p6 = por %p506_p5, %p505_p4 }
   0xd   :  { %p508_p7 = pnand %p507_p6, %p501_p3 }
   0xf   :  { %511 = shalt.err (!%p508_p7)
}
  0x10   :  { %s539_s22 = smov 768   ;;  %s540_s23 = smov 48  }
  0x11   :  { %22 = dma.hbm_to_vmem [thread:$0]  %s611_s0, 12288, %s17_s13, [#allocation4], %s539_s22, %s539_s22, %s540_s23  }
  0x12   :  { %534 = dma.done.wait [#allocation4], 12288  }
  0x13   :  { %535 = vsyncadd [#allocation4], 4294955008  ;;  %v33_v0 = vld [vmem:[#allocation3 + $0x18] sm:$0xff]  ;;  %v39_v1 = vld [vmem:[#allocation3 + $0x48] sm:$0xff]  ;;  %v130_v7 = vlaneseq  ;;  %s541_s28 = smov [#allocation6]  }
  0x14   :  { %v32_v2 = vld [vmem:[#allocation3 + $0x10] sm:$0xff]  ;;  %v418_v3 = vpack.c.bf16 %v39_v1, %v33_v0  ;;  %v38_v4 = vld [vmem:[#allocation3 + $0x40] sm:$0xff]  ;;  %v45_v5 = vld [vmem:[#allocation3 + $0x78] sm:$0xff]  ;;  %s377_s29 = sshll.u32 %s541_s28, 4  ;;  %s378_s29 = int_to_ptr.vmem [resolvable:$true] %s377_s29 }
  0x15   :  { %v51_v6 = vld [vmem:[#allocation3 + $0xa8] sm:$0xff]  ;;  %v420_v8 = vpack.c.bf16 %v38_v4, %v32_v2  ;;  %v44_v10 = vld [vmem:[#allocation3 + $0x70] sm:$0xff]  ;;  %v50_v11 = vld [vmem:[#allocation3 + $0xa0] sm:$0xff]  ;;  %v574_v12 = vshrl.u32 %v130_v7, 7  ;;  %s512_s30 = scalar_lea.vmem %s378_s29, 16  ;;  %s516_s4 = scalar_lea.vmem %s378_s29, 32 }
  0x16   :  { %v422_v9 = vpack.c.bf16 %v51_v6, %v45_v5  ;;  %419 = vmatprep.subr.bf16.mxu0 %v418_v3  ;;  %v57_v13 = vld [vmem:[#allocation3 + $0xd8] sm:$0xff]  ;;  %v63_v14 = vld [vmem:[#allocation3 + $0x108] sm:$0xff]  ;;  %v424_v15 = vpack.c.bf16 %v50_v11, %v44_v10  ;;  %v30_v22 = vld [vmem:[#allocation3] sm:$0xff]  ;;  %p513_p8 = scmp.ne.s32.totalorder %s378_s29, %s512_s30  ;;  %p517_p9 = scmp.lt.s32.totalorder %s378_s29, %s378_s29 }
  0x17   :  { %421 = vmatpush1.bf16.xpose.msra.mxu0 %v420_v8  ;;  %v426_v16 = vpack.c.bf16 %v63_v14, %v57_v13  ;;  %v144_v17 = vsub.s32 3, %v574_v12  ;;  %v136_v18 = vsub.s32 1, %v574_v12  ;;  %v31_v19 = vld [vmem:[#allocation3 + $0x8] sm:$0xff]  ;;  %v148_v20 = vsub.s32 4, %v574_v12  ;;  %v37_v21 = vld [vmem:[#allocation3 + $0x38] sm:$0xff]  ;;  %v36_v23 = vld [vmem:[#allocation3 + $0x30] sm:$0xff]  ;;  %p518_p10 = scmp.lt.s32.totalorder %s516_s4, %s512_s30 }
  0x18   :  { %423 = vmatprep.subr.bf16.mxu0 %v422_v9  ;;  %v386_v24 = vpack.c.bf16 %v37_v21, %v31_v19  ;;  %v388_v25 = vpack.c.bf16 %v36_v23, %v30_v22  ;;  %v582_v26 = vld [vmem:[%s612_s1] sm:$0x3f]  ;;  %v56_v27 = vld [vmem:[#allocation3 + $0xd0] sm:$0xff]  ;;  %v43_v30 = vld [vmem:[#allocation3 + $0x68] sm:$0xff] }
  0x19   :  { %v62_v28 = vld [vmem:[#allocation3 + $0x100] sm:$0xff]  ;;  %v145_v29 = vrot.slane %v582_v26, %v144_v17  ;;  %v137_v31 = vrot.slane %v582_v26, %v136_v18  ;;  %v69_v32 = vld [vmem:[#allocation3 + $0x138] sm:$0xff]  ;;  %v75_v33 = vld [vmem:[#allocation3 + $0x168] sm:$0xff]  ;;  %v587_v35 = vrot.slane %v582_v26, %v148_v20  ;;  %p519_p11 = por %p518_p10, %p517_p9 }
  0x1a   :  { %387 = vmatprep.subr.bf16.mxu1 %v386_v24  ;;  %v49_v34 = vld [vmem:[#allocation3 + $0x98] sm:$0xff]  ;;  %v428_v37 = vpack.c.bf16 %v62_v28, %v56_v27  ;;  %v42_v38 = vld [vmem:[#allocation3 + $0x60] sm:$0xff]  ;;  %v48_v39 = vld [vmem:[#allocation3 + $0x90] sm:$0xff]  ;;  %v430_v40 = vpack.c.bf16 %v75_v33, %v69_v32 }
  0x1b   :  { %389 = vmatpush1.bf16.xpose.msra.mxu1 %v388_v25  ;;  %294 = vmatprep.mubr.f32.mxu0 %v145_v29  ;;  %v390_v36 = vpack.c.bf16 %v49_v34, %v43_v30  ;;  %v55_v41 = vld [vmem:[#allocation3 + $0xc8] sm:$0xff]  ;;  %v61_v42 = vld [vmem:[#allocation3 + $0xf8] sm:$0xff]  ;;  %v392_v43 = vpack.c.bf16 %v48_v39, %v42_v38  ;;  %v68_v45 = vld [vmem:[#allocation3 + $0x130] sm:$0xff]  ;;  %p520_p12 = pnand %p519_p11, %p513_p8 }
  0x1c   :  { %224 = vmatprep.mubr.f32.mxu1 %v137_v31  ;;  %v394_v44 = vpack.c.bf16 %v61_v42, %v55_v41  ;;  %v74_v46 = vld [vmem:[#allocation3 + $0x160] sm:$0xff]  ;;  %v81_v47 = vld [vmem:[#allocation3 + $0x198] sm:$0xff]  ;;  %v87_v48 = vld [vmem:[#allocation3 + $0x1c8] sm:$0xff]  ;;  %v140_v42 = vsub.s32 2, %v574_v12 }
  0x1d   :  { %391 = vmatprep.subr.bf16.mxu1 %v390_v36  ;;  %v432_v49 = vpack.c.bf16 %v74_v46, %v68_v45  ;;  %v54_v50 = vld [vmem:[#allocation3 + $0xc0] sm:$0xff]  ;;  %v60_v51 = vld [vmem:[#allocation3 + $0xf0] sm:$0xff]  ;;  %v434_v52 = vpack.c.bf16 %v87_v48, %v81_v47  ;;  %v67_v53 = vld [vmem:[#allocation3 + $0x128] sm:$0xff]  ;;  %v152_v45 = vsub.s32 5, %v574_v12 }
  0x1e   :  { %v73_v54 = vld [vmem:[#allocation3 + $0x158] sm:$0xff]  ;;  %v396_v55 = vpack.c.bf16 %v60_v51, %v54_v50  ;;  %v80_v57 = vld [vmem:[#allocation3 + $0x190] sm:$0xff]  ;;  %v86_v58 = vld [vmem:[#allocation3 + $0x1c0] sm:$0xff]  ;;  %v141_v50 = vrot.slane %v582_v26, %v140_v42 }
  0x1f   :  { %425 = vmatpush1.bf16.xpose.msra.mxu0 %v424_v15  ;;  %v398_v56 = vpack.c.bf16 %v73_v54, %v67_v53  ;;  %v93_v59 = vld [vmem:[#allocation3 + $0x1f8] sm:$0xff]  ;;  %v99_v60 = vld [vmem:[#allocation3 + $0x228] sm:$0xff]  ;;  %v436_v61 = vpack.c.bf16 %v86_v58, %v80_v57  ;;  %v66_v62 = vld [vmem:[#allocation3 + $0x120] sm:$0xff]  ;;  %v153_v54 = vrot.slane %v582_v26, %v152_v45 }
  0x20   :  { %427 = vmatprep.subr.bf16.mxu0 %v426_v16  ;;  %v72_v63 = vld [vmem:[#allocation3 + $0x150] sm:$0xff]  ;;  %v438_v0 = vpack.c.bf16 %v99_v60, %v93_v59  ;;  %v79_v1 = vld [vmem:[#allocation3 + $0x188] sm:$0xff]  ;;  %v85_v2 = vld [vmem:[#allocation3 + $0x1b8] sm:$0xff] }
  0x21   :  { %v400_v3 = vpack.c.bf16 %v72_v63, %v66_v62  ;;  %v402_v4 = vpack.c.bf16 %v85_v2, %v79_v1  ;;  %v92_v5 = vld [vmem:[#allocation3 + $0x1f0] sm:$0xff]  ;;  %v98_v6 = vld [vmem:[#allocation3 + $0x220] sm:$0xff]  ;;  %v105_v7 = vld [vmem:[#allocation3 + $0x258] sm:$0xff] }
  0x22   :  { %v111_v8 = vld [vmem:[#allocation3 + $0x288] sm:$0xff]  ;;  %v440_v9 = vpack.c.bf16 %v98_v6, %v92_v5  ;;  %v78_v10 = vld [vmem:[#allocation3 + $0x180] sm:$0xff]  ;;  %v84_v11 = vld [vmem:[#allocation3 + $0x1b0] sm:$0xff] }
  0x23   :  { %393 = vmatpush1.bf16.xpose.msra.mxu1 %v392_v43  ;;  %v442_v13 = vpack.c.bf16 %v111_v8, %v105_v7  ;;  %v91_v14 = vld [vmem:[#allocation3 + $0x1e8] sm:$0xff]  ;;  %v97_v15 = vld [vmem:[#allocation3 + $0x218] sm:$0xff]  ;;  %v404_v16 = vpack.c.bf16 %v84_v11, %v78_v10  ;;  %v104_v18 = vld [vmem:[#allocation3 + $0x250] sm:$0xff] }
  0x24   :  { %395 = vmatprep.subr.bf16.mxu1 %v394_v44  ;;  %v406_v17 = vpack.c.bf16 %v97_v15, %v91_v14  ;;  %v110_v19 = vld [vmem:[#allocation3 + $0x280] sm:$0xff]  ;;  %v117_v20 = vld [vmem:[#allocation3 + $0x2b8] sm:$0xff]  ;;  %v123_v21 = vld [vmem:[#allocation3 + $0x2e8] sm:$0xff] }
  0x25   :  { %v444_v22 = vpack.c.bf16 %v110_v19, %v104_v18  ;;  %v90_v23 = vld [vmem:[#allocation3 + $0x1e0] sm:$0xff]  ;;  %v96_v24 = vld [vmem:[#allocation3 + $0x210] sm:$0xff]  ;;  %v446_v25 = vpack.c.bf16 %v123_v21, %v117_v20  ;;  %v103_v27 = vld [vmem:[#allocation3 + $0x248] sm:$0xff] }
  0x26   :  { %v109_v28 = vld [vmem:[#allocation3 + $0x278] sm:$0xff]  ;;  %v408_v29 = vpack.c.bf16 %v96_v24, %v90_v23  ;;  %v116_v31 = vld [vmem:[#allocation3 + $0x2b0] sm:$0xff]  ;;  %v122_v32 = vld [vmem:[#allocation3 + $0x2e0] sm:$0xff] }
  0x27   :  { %429 = vmatpush1.bf16.xpose.msra.mxu0 %v428_v37  ;;  %v410_v30 = vpack.c.bf16 %v109_v28, %v103_v27  ;;  %v35_v33 = vld [vmem:[#allocation3 + $0x28] sm:$0xff]  ;;  %v41_v34 = vld [vmem:[#allocation3 + $0x58] sm:$0xff]  ;;  %v448_v36 = vpack.c.bf16 %v122_v32, %v116_v31  ;;  %v102_v37 = vld [vmem:[#allocation3 + $0x240] sm:$0xff] }
  0x28   :  { %431 = vmatprep.subr.bf16.mxu0 %v430_v40  ;;  %v108_v38 = vld [vmem:[#allocation3 + $0x270] sm:$0xff]  ;;  %v450_v39 = vpack.c.bf16 %v41_v34, %v35_v33  ;;  %v115_v40 = vld [vmem:[#allocation3 + $0x2a8] sm:$0xff]  ;;  %v121_v41 = vld [vmem:[#allocation3 + $0x2d8] sm:$0xff] }
  0x29   :  { %v412_v43 = vpack.c.bf16 %v108_v38, %v102_v37  ;;  %v414_v44 = vpack.c.bf16 %v121_v41, %v115_v40  ;;  %v34_v46 = vld [vmem:[#allocation3 + $0x20] sm:$0xff]  ;;  %v40_v47 = vld [vmem:[#allocation3 + $0x50] sm:$0xff]  ;;  %v47_v48 = vld [vmem:[#allocation3 + $0x88] sm:$0xff]  ;;  %v128_v37 = vstv %s613_s2 }
  0x2a   :  { %v452_v51 = vpack.c.bf16 %v40_v47, %v34_v46  ;;  %v120_v53 = vld [vmem:[#allocation3 + $0x2d0] sm:$0xff]  ;;  %v46_v57 = vld [vmem:[#allocation3 + $0x80] sm:$0xff]  ;;  %v59_v59 = vld [vmem:[#allocation3 + $0xe8] sm:$0xff] }
  0x2b   :  { %397 = vmatpush1.bf16.xpose.msra.mxu1 %v396_v55  ;;  %v52_v58 = vld [vmem:[#allocation3 + $0xb0] sm:$0xff]  ;;  %v65_v60 = vld [vmem:[#allocation3 + $0x118] sm:$0xff]  ;;  %v58_v1 = vld [vmem:[#allocation3 + $0xe0] sm:$0xff] }
  0x2c   :  { %399 = vmatprep.subr.bf16.mxu1 %v398_v56  ;;  %v456_v62 = vpack.c.bf16 %v52_v58, %v46_v57  ;;  %v458_v63 = vpack.c.bf16 %v65_v60, %v59_v59  ;;  %v64_v2 = vld [vmem:[#allocation3 + $0x110] sm:$0xff]  ;;  %v70_v7 = vld [vmem:[#allocation3 + $0x140] sm:$0xff]  ;;  %v95_v14 = vld [vmem:[#allocation3 + $0x208] sm:$0xff] }
  0x2d   :  { %v460_v5 = vpack.c.bf16 %v64_v2, %v58_v1  ;;  %v76_v8 = vld [vmem:[#allocation3 + $0x170] sm:$0xff]  ;;  %v101_v15 = vld [vmem:[#allocation3 + $0x238] sm:$0xff]  ;;  %v94_v18 = vld [vmem:[#allocation3 + $0x200] sm:$0xff] }
  0x2e   :  { %v464_v10 = vpack.c.bf16 %v76_v8, %v70_v7  ;;  %v100_v19 = vld [vmem:[#allocation3 + $0x230] sm:$0xff]  ;;  %v107_v20 = vld [vmem:[#allocation3 + $0x268] sm:$0xff]  ;;  %v113_v21 = vld [vmem:[#allocation3 + $0x298] sm:$0xff] }
  0x2f   :  { %433 = vmatpush1.bf16.xpose.msra.mxu0 %v432_v49  ;;  %v53_v49 = vld [vmem:[#allocation3 + $0xb8] sm:$0xff]  ;;  %v474_v23 = vpack.c.bf16 %v113_v21, %v107_v20  ;;  %v106_v24 = vld [vmem:[#allocation3 + $0x260] sm:$0xff]  ;;  %v119_v27 = vld [vmem:[#allocation3 + $0x2c8] sm:$0xff] }
  0x30   :  { %435 = vmatprep.subr.bf16.mxu0 %v434_v52  ;;  %v114_v52 = vld [vmem:[#allocation3 + $0x2a0] sm:$0xff]  ;;  %v454_v55 = vpack.c.bf16 %v53_v49, %v47_v48  ;;  %v125_v28 = vld [vmem:[#allocation3 + $0x2f8] sm:$0xff]  ;;  %v124_v32 = vld [vmem:[#allocation3 + $0x2f0] sm:$0xff] }
  0x31   :  { %v416_v56 = vpack.c.bf16 %v120_v53, %v114_v52  ;;  %v118_v31 = vld [vmem:[#allocation3 + $0x2c0] sm:$0xff] }
  0x32   :  { %v480_v33 = vpack.c.bf16 %v124_v32, %v118_v31 }
  0x33   :  { %401 = vmatpush1.bf16.xpose.msra.mxu1 %v400_v3  ;;  %v71_v3 = vld [vmem:[#allocation3 + $0x148] sm:$0xff] }
  0x34   :  { %403 = vmatprep.subr.bf16.mxu1 %v402_v4  ;;  %v77_v4 = vld [vmem:[#allocation3 + $0x178] sm:$0xff] }
  0x35   :  { %v462_v6 = vpack.c.bf16 %v77_v4, %v71_v3 }
  0x37   :  { %437 = vmatpush1.bf16.xpose.msra.mxu0 %v436_v61  ;;  %v132_v61 = vsub.s32 0, %v574_v12  ;;  %v89_v12 = vld [vmem:[#allocation3 + $0x1d8] sm:$0xff] }
  0x38   :  { %439 = vmatprep.subr.bf16.mxu0 %v438_v0 }
  0x39   :  { %v133_v0 = vrot.slane %v582_v26, %v132_v61  ;;  %v82_v26 = vld [vmem:[#allocation3 + $0x1a0] sm:$0xff] }
  0x3b   :  { %405 = vmatpush1.bf16.xpose.msra.mxu1 %v404_v16 }
  0x3c   :  { %407 = vmatprep.subr.bf16.mxu1 %v406_v17  ;;  %v470_v17 = vpack.c.bf16 %v101_v15, %v95_v14 }
  0x3f   :  { %441 = vmatpush1.bf16.xpose.msra.mxu0 %v440_v9  ;;  %v83_v9 = vld [vmem:[#allocation3 + $0x1a8] sm:$0xff] }
  0x40   :  { %443 = vmatprep.subr.bf16.mxu0 %v442_v13  ;;  %v466_v11 = vpack.c.bf16 %v89_v12, %v83_v9  ;;  %v88_v13 = vld [vmem:[#allocation3 + $0x1d0] sm:$0xff] }
  0x41   :  { %v468_v16 = vpack.c.bf16 %v88_v13, %v82_v26 }
  0x43   :  { %409 = vmatpush1.bf16.xpose.msra.mxu1 %v408_v29 }
  0x44   :  { %411 = vmatprep.subr.bf16.mxu1 %v410_v30  ;;  %v478_v30 = vpack.c.bf16 %v125_v28, %v119_v27 }
  0x47   :  { %445 = vmatpush1.bf16.xpose.msra.mxu0 %v444_v22  ;;  %v472_v22 = vpack.c.bf16 %v100_v19, %v94_v18 }
  0x48   :  { %447 = vmatprep.subr.bf16.mxu0 %v446_v25  ;;  %v112_v25 = vld [vmem:[#allocation3 + $0x290] sm:$0xff] }
  0x49   :  { %v476_v29 = vpack.c.bf16 %v112_v25, %v106_v24 }
  0x4b   :  { %413 = vmatpush1.bf16.xpose.msra.mxu1 %v412_v43 }
  0x4c   :  { %415 = vmatprep.subr.bf16.mxu1 %v414_v44 }
  0x4f   :  { %449 = vmatpush1.bf16.xpose.msra.mxu0 %v448_v36 }
  0x50   :  { %451 = vmatprep.subr.bf16.mxu0 %v450_v39 }
  0x53   :  { %417 = vmatpush1.bf16.xpose.msra.mxu1 %v416_v56 }
  0x56   :  { %295 = vmatmul.mubr.f32.vlgmr.msra.gmra.mrb[0].mxu0 %v141_v50 }
  0x57   :  { %453 = vmatpush1.bf16.xpose.msra.mxu0 %v452_v51  ;;  %364 = vmatprep.mubr.f32.mxu0 %v153_v54 }
  0x58   :  { %455 = vmatprep.subr.bf16.mxu0 %v454_v55 }
  0x5a   :  { %225 = vmatmul.mubr.f32.vlgmr.msra.gmra.mrb[0].mxu1 %v133_v0 }
  0x5f   :  { %457 = vmatpush1.bf16.xpose.msra.mxu0 %v456_v62 }
  0x60   :  { %459 = vmatprep.subr.bf16.mxu0 %v458_v63 }
  0x67   :  { %461 = vmatpush1.bf16.xpose.msra.mxu0 %v460_v5 }
  0x68   :  { %463 = vmatprep.subr.bf16.mxu0 %v462_v6 }
  0x6f   :  { %465 = vmatpush1.bf16.xpose.msra.mxu0 %v464_v10 }
  0x70   :  { %467 = vmatprep.subr.bf16.mxu0 %v466_v11 }
  0x77   :  { %469 = vmatpush1.bf16.xpose.msra.mxu0 %v468_v16 }
  0x78   :  { %471 = vmatprep.subr.bf16.mxu0 %v470_v17 }
  0x7f   :  { %473 = vmatpush1.bf16.xpose.msra.mxu0 %v472_v22 }
  0x80   :  { %475 = vmatprep.subr.bf16.mxu0 %v474_v23 }
  0x87   :  { %477 = vmatpush1.bf16.xpose.msra.mxu0 %v476_v29 }
  0x88   :  { %479 = vmatprep.subr.bf16.mxu0 %v478_v30 }
  0x8f   :  { %481 = vmatpush1.bf16.xpose.msra.mxu0 %v480_v33 }
  0x96   :  { %365 = vmatmul.mubr.f32.vlgmr.msra.gmra.mrb[0].mxu0 %v587_v35 }
 0x12d   :  { %v226_v34 = vpop.f32.mrb[0].mxu1 }
 0x12e   :  { %v228_v36 = vpop.f32.mrb[1].mxu1  ;;  %v227_v38 = vadd.f32 %v226_v34, %v128_v37 }
 0x169   :  { %v366_v39 = vpop.f32.mrb[0].mxu0 }
 0x16a   :  { %v483_v40 = vadd.f32 %v366_v39, %v227_v38  ;;  %v368_v41 = vpop.f32.mrb[1].mxu0 }
 0x16c   :  { %370 = vst [vmem:[#allocation6] sm:$0x1] %v483_v40 }
 0x16d   :  { %523 = shalt.err (!%p520_p12)
}
 0x16e   :  { %s524_s2 = scalar_lea.hbm %s614_s3, 16 }
 0x16f   :  { %p525_p13 = scmp.ne.s32.totalorder %s614_s3, %s524_s2  ;;  %p528_p0 = scmp.lt.u32.totalorder %s524_s2, %s614_s3 }
 0x171   :  { %p530_p1 = pnand %p528_p0, %p525_p13 }
 0x173   :  { %533 = shalt.err (!%p530_p1)
}
 0x174   :  { %380 = dma.vmem_to_hbm [thread:$0]  %s378_s29, 16, %s614_s3, [#allocation5]  }
 0x175   :  { %536 = dma.done.wait [#allocation5], 16  }
 0x176   :  { %537 = vsyncadd [#allocation5], 4294967280 }
 0x177   :  { %384 = vsyncpa [#allocation4], 1 }
 0x178   :  { %385 = vsyncpa [#allocation5], 1 }

</bundles_post_ra>
